<compile_context>
chip_gen: v5e
topology: v5e:2x2
jax: 0.10.0
libtpu: 0.0.40
codegen_flags: <defaults>
</compile_context>

<pallas_src>
import jax
import jax.numpy as jnp
from jax.experimental import pallas as pl
from jax.experimental.pallas import tpu as pltpu

# ---- model hyperparameters (consistent with the module) ----
MID_DIM = 64
NUM_LAYERS = 3
STATE_DIM = 32
ACTION_DIM = 8
BATCH = 8          # small demo batch; wrapper handles any B

LANE = 128
SUBLANE_BF16 = 16  # bf16 packs 2 rows/sublane -> 16-row granule


def _round_up(x, m):
    return ((x + m - 1) // m) * m


MID_PAD = _round_up(MID_DIM, LANE)   # 64 -> 128 (hidden stays lane-dense in VMEM)


def actor_mlp_kernel(x_ref, w1_ref, b1_ref, w2_ref, b2_ref, w3_ref, b3_ref, o_ref):
    """Fused Linear->Tanh->Linear->Tanh->Linear on one batch tile.

    x:  (TB, STATE_DIM) bf16                 (streamed)
    w1: (STATE_DIM, MID_PAD)   bf16   b1: (1, MID_PAD)    f32   (VMEM-resident)
    w2: (MID_PAD,   MID_PAD)   bf16   b2: (1, MID_PAD)    f32   (VMEM-resident)
    w3: (MID_PAD, ACTION_DIM)  bf16   b3: (1, ACTION_DIM) f32   (VMEM-resident)
    o:  (TB, ACTION_DIM) f32                 (streamed, natural 8-wide last dim)
    """
    # TODO(synk): optional v6e/v7x micro-opt: bf16 tanh; kept f32 (v5e-safe, and
    # EUP is not the measured bottleneck).
    h1 = jnp.tanh(
        jnp.dot(x_ref[...], w1_ref[...], preferred_element_type=jnp.float32)
        + b1_ref[...]
    )
    h2 = jnp.tanh(
        jnp.dot(h1.astype(jnp.bfloat16), w2_ref[...],
                preferred_element_type=jnp.float32) + b2_ref[...]
    )
    o_ref[...] = (
        jnp.dot(h2.astype(jnp.bfloat16), w3_ref[...],
                preferred_element_type=jnp.float32) + b3_ref[...]
    ).astype(o_ref.dtype)


def actor_ppo_forward(state, packed_params, *, batch_tile=8192):
    """state: (B, STATE_DIM) f32 -> logits (B, ACTION_DIM) f32."""
    w1, b1, w2, b2, w3, b3 = packed_params
    B, S = state.shape
    assert S == STATE_DIM

    # Stream the input as bf16: the matmul operand is bf16 anyway, so numerics
    # are identical and HBM input bytes are halved.
    state = state.astype(jnp.bfloat16)

    # Batch tile: multiple of the bf16 16-sublane granule, large enough to
    # amortize per-grid-step overhead (~0.35 us).
    B16 = _round_up(B, SUBLANE_BF16)
    TB = min(_round_up(batch_tile, SUBLANE_BF16), B16)
    # v7x: ensure >=2 grid steps so the "parallel" axis shards across both TCs
    # (harmless on single-TC v5e/v6e, skipped for tiny batches).
    if B16 <= TB and TB >= 2 * SUBLANE_BF16:
        TB = _round_up(TB // 2, SUBLANE_BF16)
    B_pad = _round_up(B, TB)
    if B_pad != B:
        state = jnp.pad(state, ((0, B_pad - B), (0, 0)))
    grid = (B_pad // TB,)

    # Advisory cost estimate for XLA's scheduler.
    flops = 2 * B_pad * (STATE_DIM * MID_PAD + MID_PAD * MID_PAD
                         + MID_PAD * ACTION_DIM)
    transcendentals = B_pad * 2 * MID_PAD
    bytes_accessed = (
        B_pad * STATE_DIM * 2                                    # bf16 state stream
        + B_pad * ACTION_DIM * 4                                 # f32 logits stream
        + sum(int(a.size) * a.dtype.itemsize for a in (w1, b1, w2, b2, w3, b3))
    )

    keep = lambda i: (0, 0)  # weights/biases: same block every step -> VMEM-resident
    out = pl.pallas_call(
        actor_mlp_kernel,
        out_shape=jax.ShapeDtypeStruct((B_pad, ACTION_DIM), jnp.float32),
        grid_spec=pltpu.PrefetchScalarGridSpec(
            num_scalar_prefetch=0,
            grid=grid,
            in_specs=[
                pl.BlockSpec((TB, STATE_DIM), lambda i: (i, 0)),    # state (streamed)
                pl.BlockSpec((STATE_DIM, MID_PAD), keep),           # w1
                pl.BlockSpec((1, MID_PAD), keep),                   # b1
                pl.BlockSpec((MID_PAD, MID_PAD), keep),             # w2
                pl.BlockSpec((1, MID_PAD), keep),                   # b2
                pl.BlockSpec((MID_PAD, ACTION_DIM), keep),          # w3 (natural 8-wide)
                pl.BlockSpec((1, ACTION_DIM), keep),                # b3 (natural 8-wide)
            ],
            out_specs=pl.BlockSpec((TB, ACTION_DIM), lambda i: (i, 0)),
        ),
        compiler_params=pltpu.CompilerParams(
            dimension_semantics=("parallel",),
        ),
        cost_estimate=pl.CostEstimate(
            flops=flops,
            transcendentals=transcendentals,
            bytes_accessed=bytes_accessed,
        ),
    )(state, w1, b1, w2, b2, w3, b3)
    return out[:B]


def init_params(key):
    """Unpadded f32 parameters matching build_mlp(MID_DIM, 3, STATE_DIM, ACTION_DIM).
    Weights stored as [in, out]."""
    k1, k2, k3 = jax.random.split(key, 3)
    scale = 0.1
    w1 = scale * jax.random.normal(k1, (STATE_DIM, MID_DIM), jnp.float32)
    b1 = jnp.zeros((1, MID_DIM), jnp.float32)
    w2 = scale * jax.random.normal(k2, (MID_DIM, MID_DIM), jnp.float32)
    b2 = jnp.zeros((1, MID_DIM), jnp.float32)
    w3 = scale * jax.random.normal(k3, (MID_DIM, ACTION_DIM), jnp.float32)
    b3 = jnp.zeros((1, ACTION_DIM), jnp.float32)
    # action_std_log exists on the module but is unused by forward().
    return (w1, b1, w2, b2, w3, b3)


def pack_params(raw_params):
    """Zero-pad hidden lane dim to 128, cast matmul weights to bf16.
    Layer-3 weight/bias keep their natural ACTION_DIM-wide last dim; biases stay f32."""
    w1, b1, w2, b2, w3, b3 = raw_params

    def pad2(a, rows, cols):
        return jnp.pad(a, ((0, rows - a.shape[0]), (0, cols - a.shape[1])))

    return (
        pad2(w1, STATE_DIM, MID_PAD).astype(jnp.bfloat16),
        pad2(b1, 1, MID_PAD),
        pad2(w2, MID_PAD, MID_PAD).astype(jnp.bfloat16),
        pad2(b2, 1, MID_PAD),
        pad2(w3, MID_PAD, ACTION_DIM).astype(jnp.bfloat16),   # pad rows only
        b3,                                                    # (1, ACTION_DIM) f32
    )


def reference_forward_f32(state, raw_params):
    """Exact f32 forward of the original PyTorch module (true semantics)."""
    w1, b1, w2, b2, w3, b3 = raw_params
    h1 = jnp.tanh(state @ w1 + b1)
    h2 = jnp.tanh(h1 @ w2 + b2)
    return h2 @ w3 + b3


def reference_forward_bf16(state, raw_params):
    """Mirrors the kernel's numerics: bf16 matmul operands, f32 accumulation/tanh."""
    w1, b1, w2, b2, w3, b3 = raw_params

    def dot_bf16(a, w):
        return jnp.dot(a.astype(jnp.bfloat16), w.astype(jnp.bfloat16),
                       preferred_element_type=jnp.float32)

    h1 = jnp.tanh(dot_bf16(state, w1) + b1)
    h2 = jnp.tanh(dot_bf16(h1, w2) + b2)
    return dot_bf16(h2, w3) + b3


if __name__ == "__main__":
    key = jax.random.PRNGKey(0)
    kp, ks = jax.random.split(key)
    raw_params = init_params(kp)
    packed = pack_params(raw_params)
    state = jax.random.normal(ks, (BATCH, STATE_DIM), jnp.float32)

    out = actor_ppo_forward(state, packed)
    out = jax.block_until_ready(out)
    assert out.shape == (BATCH, ACTION_DIM)

    # Check against the kernel-equivalent bf16 reference (tight tolerance) ...
    ref_bf16 = reference_forward_bf16(state, raw_params)
    assert jnp.allclose(out, ref_bf16, atol=5e-3, rtol=5e-3), (
        float(jnp.max(jnp.abs(out - ref_bf16))))
    # ... and against the true f32 module forward (bf16 weight-cast tolerance).
    ref_f32 = reference_forward_f32(state, raw_params)
    assert jnp.allclose(out, ref_f32, atol=3e-2, rtol=3e-2), (
        float(jnp.max(jnp.abs(out - ref_f32))))

    print("KERNEL_OK")
</pallas_src>

<mosaic_0001>
module attributes {stable_mosaic.version = 11 : i64} {
  func.func @actor_mlp_kernel(%arg0: i32, %arg1: memref<16x32xbf16, #tpu.memory_space<vmem>>, %arg2: memref<32x128xbf16, #tpu.memory_space<vmem>>, %arg3: memref<1x128xf32, #tpu.memory_space<vmem>>, %arg4: memref<128x128xbf16, #tpu.memory_space<vmem>>, %arg5: memref<1x128xf32, #tpu.memory_space<vmem>>, %arg6: memref<128x8xbf16, #tpu.memory_space<vmem>>, %arg7: memref<1x8xf32, #tpu.memory_space<vmem>>, %arg8: memref<16x8xf32, #tpu.memory_space<vmem>>) attributes {dimension_semantics = [#tpu.dimension_semantics<parallel>], iteration_bounds = array<i64: 1>, scalar_prefetch = 0 : i64, scratch_operands = 0 : i64, tpu.core_type = #tpu.core_type<tc>, window_params = [{transform_indices = @transform_0, window_bounds = array<i64: 16, 32>}, {pipeline_mode = #tpu.pipeline_mode<synchronous>, transform_indices = @transform_1, window_bounds = array<i64: 32, 128>}, {pipeline_mode = #tpu.pipeline_mode<synchronous>, transform_indices = @transform_2, window_bounds = array<i64: 1, 128>}, {pipeline_mode = #tpu.pipeline_mode<synchronous>, transform_indices = @transform_3, window_bounds = array<i64: 128, 128>}, {pipeline_mode = #tpu.pipeline_mode<synchronous>, transform_indices = @transform_4, window_bounds = array<i64: 1, 128>}, {pipeline_mode = #tpu.pipeline_mode<synchronous>, transform_indices = @transform_5, window_bounds = array<i64: 128, 8>}, {pipeline_mode = #tpu.pipeline_mode<synchronous>, transform_indices = @transform_6, window_bounds = array<i64: 1, 8>}, {transform_indices = @transform_7, window_bounds = array<i64: 16, 8>}]} {
    %c0 = arith.constant 0 : index
    %c0_0 = arith.constant 0 : index
    %0 = vector.load %arg1[%c0, %c0_0] : memref<16x32xbf16, #tpu.memory_space<vmem>>, vector<16x32xbf16>
    %c0_1 = arith.constant 0 : index
    %c0_2 = arith.constant 0 : index
    %1 = vector.load %arg2[%c0_1, %c0_2] : memref<32x128xbf16, #tpu.memory_space<vmem>>, vector<32x128xbf16>
    %cst = arith.constant dense<0.000000e+00> : vector<16x128xf32>
    %2 = tpu.matmul %0, %1, %cst {dimension_numbers = #tpu.dot_dimension_numbers<[1], [0], [0], [1], [0, 0, 1, 1], [], []>} : vector<16x32xbf16>, vector<32x128xbf16>, vector<16x128xf32> -> vector<16x128xf32>
    %c0_3 = arith.constant 0 : index
    %c0_4 = arith.constant 0 : index
    %3 = vector.load %arg3[%c0_3, %c0_4] : memref<1x128xf32, #tpu.memory_space<vmem>>, vector<1x128xf32>
    %4 = vector.broadcast %3 : vector<1x128xf32> to vector<16x128xf32>
    %5 = arith.addf %2, %4 : vector<16x128xf32>
    %6 = math.tanh %5 : vector<16x128xf32>
    %7 = arith.truncf %6 : vector<16x128xf32> to vector<16x128xbf16>
    %c0_5 = arith.constant 0 : index
    %c0_6 = arith.constant 0 : index
    %8 = vector.load %arg4[%c0_5, %c0_6] : memref<128x128xbf16, #tpu.memory_space<vmem>>, vector<128x128xbf16>
    %cst_7 = arith.constant dense<0.000000e+00> : vector<16x128xf32>
    %9 = tpu.matmul %7, %8, %cst_7 {dimension_numbers = #tpu.dot_dimension_numbers<[1], [0], [0], [1], [0, 0, 1, 1], [], []>} : vector<16x128xbf16>, vector<128x128xbf16>, vector<16x128xf32> -> vector<16x128xf32>
    %c0_8 = arith.constant 0 : index
    %c0_9 = arith.constant 0 : index
    %10 = vector.load %arg5[%c0_8, %c0_9] : memref<1x128xf32, #tpu.memory_space<vmem>>, vector<1x128xf32>
    %11 = vector.broadcast %10 : vector<1x128xf32> to vector<16x128xf32>
    %12 = arith.addf %9, %11 : vector<16x128xf32>
    %13 = math.tanh %12 : vector<16x128xf32>
    %14 = arith.truncf %13 : vector<16x128xf32> to vector<16x128xbf16>
    %c0_10 = arith.constant 0 : index
    %c0_11 = arith.constant 0 : index
    %15 = vector.load %arg6[%c0_10, %c0_11] : memref<128x8xbf16, #tpu.memory_space<vmem>>, vector<128x8xbf16>
    %cst_12 = arith.constant dense<0.000000e+00> : vector<16x8xf32>
    %16 = tpu.matmul %14, %15, %cst_12 {dimension_numbers = #tpu.dot_dimension_numbers<[1], [0], [0], [1], [0, 0, 1, 1], [], []>} : vector<16x128xbf16>, vector<128x8xbf16>, vector<16x8xf32> -> vector<16x8xf32>
    %c0_13 = arith.constant 0 : index
    %c0_14 = arith.constant 0 : index
    %17 = vector.load %arg7[%c0_13, %c0_14] : memref<1x8xf32, #tpu.memory_space<vmem>>, vector<1x8xf32>
    %18 = vector.broadcast %17 : vector<1x8xf32> to vector<16x8xf32>
    %19 = arith.addf %16, %18 : vector<16x8xf32>
    %c0_15 = arith.constant 0 : index
    %c0_16 = arith.constant 0 : index
    %20 = vector.load %arg8[%c0_15, %c0_16] : memref<16x8xf32, #tpu.memory_space<vmem>>, vector<16x8xf32>
    tpu.vector_store %arg8[%c0_15, %c0_16], %19 {strides = array<i32>} : memref<16x8xf32, #tpu.memory_space<vmem>>, vector<16x8xf32>,
    return
  }
  func.func @transform_0(%arg0: i32) -> (i32, i32) {
    %c0_i32 = arith.constant 0 : i32
    %c0_i32_0 = arith.constant 0 : i32
    return %arg0, %c0_i32 : i32, i32
  }
  func.func @transform_1(%arg0: i32) -> (i32, i32) {
    %c0_i32 = arith.constant 0 : i32
    %c0_i32_0 = arith.constant 0 : i32
    %c0_i32_1 = arith.constant 0 : i32
    return %c0_i32, %c0_i32_0 : i32, i32
  }
  func.func @transform_2(%arg0: i32) -> (i32, i32) {
    %c0_i32 = arith.constant 0 : i32
    %c0_i32_0 = arith.constant 0 : i32
    %c0_i32_1 = arith.constant 0 : i32
    return %c0_i32, %c0_i32_0 : i32, i32
  }
  func.func @transform_3(%arg0: i32) -> (i32, i32) {
    %c0_i32 = arith.constant 0 : i32
    %c0_i32_0 = arith.constant 0 : i32
    %c0_i32_1 = arith.constant 0 : i32
    return %c0_i32, %c0_i32_0 : i32, i32
  }
  func.func @transform_4(%arg0: i32) -> (i32, i32) {
    %c0_i32 = arith.constant 0 : i32
    %c0_i32_0 = arith.constant 0 : i32
    %c0_i32_1 = arith.constant 0 : i32
    return %c0_i32, %c0_i32_0 : i32, i32
  }
  func.func @transform_5(%arg0: i32) -> (i32, i32) {
    %c0_i32 = arith.constant 0 : i32
    %c0_i32_0 = arith.constant 0 : i32
    %c0_i32_1 = arith.constant 0 : i32
    return %c0_i32, %c0_i32_0 : i32, i32
  }
  func.func @transform_6(%arg0: i32) -> (i32, i32) {
    %c0_i32 = arith.constant 0 : i32
    %c0_i32_0 = arith.constant 0 : i32
    %c0_i32_1 = arith.constant 0 : i32
    return %c0_i32, %c0_i32_0 : i32, i32
  }
  func.func @transform_7(%arg0: i32) -> (i32, i32) {
    %c0_i32 = arith.constant 0 : i32
    %c0_i32_0 = arith.constant 0 : i32
    return %arg0, %c0_i32 : i32, i32
  }
}

</mosaic_0001>

<bundles_post_ra>
// kernel: tpu_custom_call.1
= control target key start
LH: loop header
LB: loop body
LE: loop exit
PB: predicated region body
PF: predicated region fallthrough
CT: control target
= control target key end

     0   :  { %12 = vsyncpa [#allocation3], 0  ;;  %s559_s0 = inlined_call_operand.hbm [shape: bf16[16,32], index: 0, kind: input, shape index: {}]   ;;  %s560_s1 = inlined_call_operand.hbm [shape: bf16[32,128], index: 1, kind: input, shape index: {}]   ;;  %s561_s2 = inlined_call_operand.vmem [shape: f32[1,128], index: 2, kind: input, shape index: {}]   ;;  %s562_s3 = inlined_call_operand.vmem [shape: bf16[128,128], index: 3, kind: input, shape index: {}]   ;;  %s563_s4 = inlined_call_operand.vmem [shape: f32[1,128], index: 4, kind: input, shape index: {}]   ;;  %s564_s5 = inlined_call_operand.vmem [shape: bf16[128,8], index: 5, kind: input, shape index: {}]   ;;  %s565_s6 = inlined_call_operand.vmem [shape: f32[1,8], index: 6, kind: input, shape index: {}]   ;;  %s566_s7 = inlined_call_operand.vmem [shape: f32[16,8], index: 7, kind: output, shape index: {}]  }
   0x1   :  { %s18_s26 = sshll.u32 %s559_s0, 4  ;;  %s19_s26 = int_to_ptr.hbm [resolvable:$true] %s18_s26 }
   0x2   :  { %13 = vsyncpa [#allocation5], 0  ;;  %s446_s27 = smov [#allocation2]   ;;  %s31_s8 = sshll.u32 %s560_s1, 4  ;;  %s32_s8 = int_to_ptr.hbm [resolvable:$true] %s31_s8 }
   0x3   :  { %s20_s28 = sshll.u32 %s446_s27, 4  ;;  %s447_s9 = smov 64   ;;  %s21_s28 = int_to_ptr.vmem [resolvable:$true] %s20_s28 }
   0x4   :  { %s448_s10 = smov 4   ;;  %s449_s11 = smov [#allocation4]  }
   0x5   :  { %26 = dma.hbm_to_vmem [thread:$0]  %s19_s26, 128, %s21_s28, [#allocation3], %s447_s9, %s447_s9, %s448_s10  }
   0x6   :  { %s33_s12 = sshll.u32 %s449_s11, 4  ;;  %s34_s12 = int_to_ptr.vmem [resolvable:$true] %s33_s12 }
   0x7   :  { %39 = dma.hbm_to_vmem [thread:$0]  %s32_s8, 256, %s34_s12, [#allocation5], %s447_s9, %s447_s9, %s448_s10  }
   0x8   :  { %442 = dma.done.wait [#allocation3], 128  }
   0x9   :  { %443 = vsyncadd [#allocation3], 4294967168 }
   0xa   :  { %444 = dma.done.wait [#allocation5], 256  }
   0xb   :  { %445 = vsyncadd [#allocation5], 4294967040  ;;  %v362_v0 = vld [vmem:[#allocation4 + $0x8] sm:$0xff]  ;;  %v370_v1 = vld [vmem:[%s562_s3 + $0x38] sm:$0xff]  ;;  %vm86_vm0 = vcmask 261120   ;;  %vm274_vm1 = vcmask 64512  }
   0xc   :  { %96 = vmatpush.bf16.msra.mxu0 %v362_v0  ;;  %v361_v2 = vld [vmem:[#allocation4] sm:$0xff]  ;;  %175 = vmatpush.bf16.msra.mxu1 %v370_v1  ;;  %v369_v3 = vld [vmem:[%s562_s3 + $0x30] sm:$0xff]  ;;  %v360_v4 = vld [vmem:[#allocation2] sm:$0xff] }
   0xd   :  { %v368_v5 = vld [vmem:[%s562_s3 + $0x28] sm:$0xff]  ;;  %v367_v6 = vld [vmem:[%s562_s3 + $0x20] sm:$0xff]  ;;  %v366_v7 = vld [vmem:[%s562_s3 + $0x18] sm:$0xff] }
   0xe   :  { %v365_v8 = vld [vmem:[%s562_s3 + $0x10] sm:$0xff]  ;;  %v364_v9 = vld [vmem:[%s562_s3 + $0x8] sm:$0xff]  ;;  %v363_v10 = vld [vmem:[%s562_s3] sm:$0xff] }
   0xf   :  { %v378_v11 = vld [vmem:[%s564_s5 + $0x38] sm:$0xff]  ;;  %v377_v12 = vld [vmem:[%s564_s5 + $0x30] sm:$0xff]  ;;  %v376_v13 = vld [vmem:[%s564_s5 + $0x28] sm:$0xff] }
  0x10   :  { %97 = vmatpush.bf16.msra.mxu0 %v361_v2  ;;  %176 = vmatpush.bf16.msra.mxu1 %v369_v3  ;;  %v383_v15 = vld [vmem:[%s561_s2] ss:$0 sm:$0xff]  ;;  %v374_v23 = vld [vmem:[%s564_s5 + $0x18] sm:$0xff]  ;;  %v373_v24 = vld [vmem:[%s564_s5 + $0x10] sm:$0xff] }
  0x11   :  { %260 = vmatpush.bf16.msra.mxu2 %v378_v11  ;;  %v375_v22 = vld [vmem:[%s564_s5 + $0x20] sm:$0xff]  ;;  %v372_v25 = vld [vmem:[%s564_s5 + $0x8] sm:$0xff] }
  0x12   :  { %v371_v26 = vld [vmem:[%s564_s5] sm:$0xff] }
  0x13   :  { %295 = vmatmul.msk.bf16.vlgmr.msra.gmra.mxu0 %vm86_vm0, %v360_v4  ;;  %v384_v28 = vld [vmem:[%s563_s4] ss:$0 sm:$0xff] }
  0x14   :  { %177 = vmatpush.bf16.msra.mxu1 %v368_v5  ;;  %v385_v35 = vld [vmem:[%s565_s6] ss:$0 sm:$0xff] }
  0x15   :  { %261 = vmatpush.bf16.msra.mxu2 %v377_v12 }
  0x18   :  { %178 = vmatpush.bf16.msra.mxu1 %v367_v6 }
  0x19   :  { %262 = vmatpush.bf16.msra.mxu2 %v376_v13 }
  0x1c   :  { %179 = vmatpush.bf16.msra.mxu1 %v366_v7 }
  0x1d   :  { %263 = vmatpush.bf16.msra.mxu2 %v375_v22 }
  0x20   :  { %180 = vmatpush.bf16.msra.mxu1 %v365_v8 }
  0x21   :  { %264 = vmatpush.bf16.msra.mxu2 %v374_v23 }
  0x24   :  { %181 = vmatpush.bf16.msra.mxu1 %v364_v9 }
  0x25   :  { %265 = vmatpush.bf16.msra.mxu2 %v373_v24 }
  0x28   :  { %182 = vmatpush.bf16.msra.mxu1 %v363_v10 }
  0x29   :  { %266 = vmatpush.bf16.msra.mxu2 %v372_v25 }
  0x2d   :  { %267 = vmatpush.bf16.msra.mxu2 %v371_v26 }
  0x90   :  { %v99_v14 = vpop.f32.mrf.mxu0 }
  0x91   :  { %v100_v16 = vadd.f32 %v383_v15, %v99_v14 }
  0x93   :  { %386 = vtanh.f32 %v100_v16 }
  0x98   :  { %v101_v17 = vpop.f32.mrf.mxu0 }
  0x99   :  { %v102_v18 = vadd.f32 %v383_v15, %v101_v17  ;;  %v387_v19 = vpop.eup %386 }
  0x9b   :  { %388 = vtanh.f32 %v102_v18 }
  0xa1   :  { %v389_v20 = vpop.eup %388 }
  0xa2   :  { %v106_v21 = vpack.c.bf16 %v389_v20, %v387_v19 }
  0xa4   :  { %183 = vmatmul.bf16.vlgmr.msra.gmra.mxu1 %v106_v21 }
 0x121   :  { %v184_v27 = vpop.f32.mrf.mxu1 }
 0x122   :  { %v185_v29 = vadd.f32 %v384_v28, %v184_v27 }
 0x124   :  { %390 = vtanh.f32 %v185_v29 }
 0x129   :  { %v186_v30 = vpop.f32.mrf.mxu1 }
 0x12a   :  { %v187_v31 = vadd.f32 %v384_v28, %v186_v30  ;;  %v391_v32 = vpop.eup %390 }
 0x12c   :  { %392 = vtanh.f32 %v187_v31 }
 0x132   :  { %v393_v33 = vpop.eup %392 }
 0x133   :  { %v191_v34 = vpack.c.bf16 %v393_v33, %v391_v32 }
 0x135   :  { %268 = vmatmul.bf16.vlgmr.msra.gmra.mxu2 %v191_v34 }
 0x1b8   :  { %v269_v36 = vpop.f32.mrf.mxu2 }
 0x1b9   :  { %v270_v37 = vadd.f32 %v385_v35, %v269_v36 }
 0x1bb   :  { %275 = vst.msk [vmem:[%s566_s7] sm:$0xff] %vm274_vm1, %v270_v37 }
 0x1c0   :  { %v271_v38 = vpop.f32.mrf.mxu2 }
 0x1c1   :  { %v272_v39 = vadd.f32 %v385_v35, %v271_v38 }
 0x1c3   :  { %276 = vst.msk [vmem:[%s566_s7 + $0x8] sm:$0xff] %vm274_vm1, %v272_v39 }
 0x1c4   :  { %281 = vsyncpa [#allocation3], 1 }
 0x1c5   :  { %282 = vsyncpa [#allocation5], 1 }

</bundles_post_ra>
